<compile_context>
chip_gen: v5e
topology: v5e:2x2
jax: 0.10.0
libtpu: 0.0.40
codegen_flags: <defaults>
</compile_context>

<pallas_src>
import functools

import jax
import jax.numpy as jnp
from jax.experimental import pallas as pl
from jax.experimental.pallas import tpu as pltpu


LANE = 128            # lane width: pad every feature dim to a multiple of this
TM_LARGE = 512        # row tile over nodes for large graphs
TK_LARGE = 1024       # contraction (neighbor) tile for large graphs
VMEM_LIMIT = 48 * 1024 * 1024


def _pad_to(n, m):
    return ((n + m - 1) // m) * m


def _choose_tiling(n):
    """(n_pad, tm, tk): pad node count so the chosen tiles divide it evenly."""
    n_pad = _pad_to(max(n, 8), LANE)
    if n_pad <= 1024:
        # single row tile / single K tile — whole A_hat block streamed once
        return n_pad, n_pad, n_pad
    tm, tk = TM_LARGE, TK_LARGE
    n_pad = _pad_to(n_pad, tk)        # tk is a multiple of tm, so both divide
    return n_pad, tm, tk


# ----------------------------- Pallas kernels -----------------------------

def _gcn_layer_kernel(a_ref, x_ref, w_ref, b_ref, o_ref, acc_ref):
    """Fused GCNConv layer: relu(A_hat @ (X @ W) + b), streamed over K."""
    k = pl.program_id(1)

    @pl.when(k == 0)
    def _():
        # fold the bias into the accumulator init (saves a VPU pass later)
        acc_ref[...] = jnp.broadcast_to(b_ref[...], acc_ref.shape).astype(
            jnp.float32)

    # in-kernel feature transform for this K tile (W is VMEM-resident)
    xw = jnp.dot(x_ref[...], w_ref[...],
                 preferred_element_type=jnp.float32).astype(jnp.bfloat16)
    # streamed aggregate with f32 accumulation on the MXU
    acc_ref[...] += jnp.dot(a_ref[...], xw,
                            preferred_element_type=jnp.float32)

    @pl.when(k == pl.num_programs(1) - 1)
    def _():
        o_ref[...] = jnp.maximum(acc_ref[...], 0.0).astype(o_ref.dtype)


def _readout_softmax_kernel(x_ref, w_ref, b_ref, o_ref, *, num_valid):
    logits = jnp.dot(x_ref[...], w_ref[...],
                     preferred_element_type=jnp.float32) + b_ref[...]
    # mask padded output lanes to -inf so they contribute 0 to the softmax
    lane = jax.lax.broadcasted_iota(jnp.int32, logits.shape, 1)
    logits = jnp.where(lane < num_valid, logits, -jnp.inf)
    m = jnp.max(logits, axis=1, keepdims=True)
    e = jnp.exp(logits - m)
    denom = jnp.sum(e, axis=1, keepdims=True)
    o_ref[...] = (e / denom).astype(o_ref.dtype)


# --------------------------- pallas_call wrappers ---------------------------

def gcn_layer(a_hat, x, w, b, *, tm, tk):
    """relu(A_hat @ (x @ w) + b) in one fused, pipelined pallas_call."""
    n_pad = a_hat.shape[0]
    f_in = x.shape[1]
    f_out = w.shape[1]
    return pl.pallas_call(
        _gcn_layer_kernel,
        out_shape=jax.ShapeDtypeStruct((n_pad, f_out), jnp.bfloat16),
        grid=(n_pad // tm, n_pad // tk),
        in_specs=[
            pl.BlockSpec((tm, tk), lambda i, k: (i, k)),        # A_hat tile
            pl.BlockSpec((tk, f_in), lambda i, k: (k, 0)),      # X K-tile
            pl.BlockSpec((f_in, f_out), lambda i, k: (0, 0)),   # W (resident)
            pl.BlockSpec((1, f_out), lambda i, k: (0, 0)),      # bias (resident)
        ],
        out_specs=pl.BlockSpec((tm, f_out), lambda i, k: (i, 0)),
        scratch_shapes=[pltpu.VMEM((tm, f_out), jnp.float32)],
        compiler_params=pltpu.CompilerParams(
            dimension_semantics=("parallel", "arbitrary"),
            vmem_limit_bytes=VMEM_LIMIT),
    )(a_hat, x, w, b)


def readout_softmax(x, w, b, num_valid_cols, *, tm):
    n_pad, f_in = x.shape
    f_out = w.shape[1]
    kernel = functools.partial(_readout_softmax_kernel, num_valid=num_valid_cols)
    return pl.pallas_call(
        kernel,
        out_shape=jax.ShapeDtypeStruct((n_pad, f_out), jnp.float32),
        grid=(n_pad // tm,),
        in_specs=[pl.BlockSpec((tm, f_in), lambda i: (i, 0)),
                  pl.BlockSpec((f_in, f_out), lambda i: (0, 0)),
                  pl.BlockSpec((1, f_out), lambda i: (0, 0))],
        out_specs=pl.BlockSpec((tm, f_out), lambda i: (i, 0)),
        compiler_params=pltpu.CompilerParams(
            dimension_semantics=("parallel",),
            vmem_limit_bytes=VMEM_LIMIT),
    )(x, w, b)


# ------------------------------ JAX glue ----------------------------------

def normalized_adjacency_padded(edge_index, num_nodes, n_pad):
    """Dense A_hat = D^-1/2 (A + I) D^-1/2, built directly zero-padded + bf16.

    Padded rows/cols have zero degree -> zero rows/cols in A_hat.
    """
    src, dst = edge_index[0], edge_index[1]
    a = jnp.zeros((n_pad, n_pad), jnp.float32)
    # message flows src -> dst  (row = dst, col = src), like PyG's GCNConv
    a = a.at[dst, src].set(1.0)
    # add_remaining_self_loops semantics: diagonal (real nodes only) is 1
    idx = jnp.arange(num_nodes)
    a = a.at[idx, idx].set(1.0)
    deg = jnp.sum(a, axis=1)
    d_inv_sqrt = jnp.where(deg > 0, jax.lax.rsqrt(deg), 0.0)
    return (a * d_inv_sqrt[:, None] * d_inv_sqrt[None, :]).astype(jnp.bfloat16)


def init_gcn_params(key, input_dim, hidden_dims, output_dim):
    """Deterministic Glorot-style init matching the module's parameter shapes."""
    params = {"convs": [], "readout": None}
    dims = [input_dim] + list(hidden_dims)
    for i in range(len(hidden_dims)):
        key, kw = jax.random.split(key)
        fan_in, fan_out = dims[i], dims[i + 1]
        scale = jnp.sqrt(6.0 / (fan_in + fan_out))
        w = jax.random.uniform(kw, (fan_in, fan_out), jnp.float32, -scale, scale)
        b = jnp.zeros((1, fan_out), jnp.float32)
        params["convs"].append((w, b))
    key, kw = jax.random.split(key)
    fan_in, fan_out = hidden_dims[-1], output_dim
    scale = jnp.sqrt(6.0 / (fan_in + fan_out))
    wr = jax.random.uniform(kw, (fan_in, fan_out), jnp.float32, -scale, scale)
    br = jnp.zeros((1, fan_out), jnp.float32)
    params["readout"] = (wr, br)
    return params


@jax.jit
def gcn_forward(params, x, edge_index):
    """Forward pass of GCN (eval mode: dropout == identity)."""
    n, f_in = x.shape
    n_pad, tm, tk = _choose_tiling(n)

    # dense normalized adjacency, built padded + bf16 for streaming
    a_hat = normalized_adjacency_padded(edge_index, n, n_pad)

    f_in_pad = _pad_to(f_in, LANE)
    h = jnp.pad(x, ((0, n_pad - n), (0, f_in_pad - f_in))).astype(jnp.bfloat16)

    for (w, b) in params["convs"]:
        fi, fo = w.shape
        fi_pad, fo_pad = _pad_to(fi, LANE), _pad_to(fo, LANE)
        w_p = jnp.pad(w, ((0, fi_pad - fi), (0, fo_pad - fo))).astype(jnp.bfloat16)
        b_p = jnp.pad(b, ((0, 0), (0, fo_pad - fo))).astype(jnp.float32)

        # fused: relu(A_hat @ (h @ W) + b) — no XW HBM round trip
        h = gcn_layer(a_hat, h, w_p, b_p, tm=tm, tk=tk)
        # F.dropout(h, p, training=False) -> identity

    wr, br = params["readout"]
    fi, fo = wr.shape
    fi_pad, fo_pad = _pad_to(fi, LANE), _pad_to(fo, LANE)
    wr_p = jnp.pad(wr, ((0, fi_pad - fi), (0, fo_pad - fo))).astype(jnp.bfloat16)
    br_p = jnp.pad(br, ((0, 0), (0, fo_pad - fo))).astype(jnp.float32)

    out = readout_softmax(h, wr_p, br_p, fo, tm=tm)      # softmax over dim=1
    return out[:n, :fo]


# ------------------------------ demo / test --------------------------------

if __name__ == "__main__":
    key = jax.random.PRNGKey(0)

    num_nodes = 16
    input_dim = 8
    hidden_dims = [32, 16]
    output_dim = 4
    num_edges = 40

    key, kx, ke, kp = jax.random.split(key, 4)
    x = jax.random.normal(kx, (num_nodes, input_dim), jnp.float32)
    edge_index = jax.random.randint(ke, (2, num_edges), 0, num_nodes,
                                    dtype=jnp.int32)

    params = init_gcn_params(kp, input_dim, hidden_dims, output_dim)

    out = gcn_forward(params, x, edge_index)
    out = jax.block_until_ready(out)

    assert out.shape == (num_nodes, output_dim)
    # rows of a softmax must sum to ~1 (bf16 inputs -> relaxed tolerance)
    assert bool(jnp.allclose(jnp.sum(out, axis=1), 1.0, atol=1e-2))
    assert bool(jnp.all(out >= 0.0))

    print("KERNEL_OK")
</pallas_src>

<mosaic_0001>
module attributes {stable_mosaic.version = 11 : i64} {
  func.func @_gcn_layer_kernel(%arg0: i32, %arg1: i32, %arg2: memref<128x128xbf16, #tpu.memory_space<vmem>>, %arg3: memref<128x128xbf16, #tpu.memory_space<vmem>>, %arg4: memref<128x128xbf16, #tpu.memory_space<vmem>>, %arg5: memref<1x128xf32, #tpu.memory_space<vmem>>, %arg6: memref<128x128xbf16, #tpu.memory_space<vmem>>, %arg7: memref<128x128xf32, #tpu.memory_space<vmem>>) attributes {dimension_semantics = [#tpu.dimension_semantics<parallel>, #tpu.dimension_semantics<arbitrary>], iteration_bounds = array<i64: 1, 1>, scalar_prefetch = 0 : i64, scratch_operands = 1 : i64, tpu.core_type = #tpu.core_type<tc>, window_params = [{transform_indices = @transform_0, window_bounds = array<i64: 128, 128>}, {transform_indices = @transform_1, window_bounds = array<i64: 128, 128>}, {pipeline_mode = #tpu.pipeline_mode<synchronous>, transform_indices = @transform_2, window_bounds = array<i64: 128, 128>}, {pipeline_mode = #tpu.pipeline_mode<synchronous>, transform_indices = @transform_3, window_bounds = array<i64: 1, 128>}, {transform_indices = @transform_4, window_bounds = array<i64: 128, 128>}]} {
    %c0_i32 = arith.constant 0 : i32
    %0 = arith.cmpi eq, %arg1, %c0_i32 : i32
    %1 = arith.extui %0 : i1 to i32
    %c0_i32_0 = arith.constant 0 : i32
    %2 = arith.cmpi ne, %1, %c0_i32_0 : i32
    scf.if %2 {
      %c0_13 = arith.constant 0 : index
      %c0_14 = arith.constant 0 : index
      %15 = vector.load %arg5[%c0_13, %c0_14] : memref<1x128xf32, #tpu.memory_space<vmem>>, vector<1x128xf32>
      %16 = vector.shape_cast %15 : vector<1x128xf32> to vector<1x128xf32>
      %17 = vector.broadcast %16 : vector<1x128xf32> to vector<128x128xf32>
      %c0_15 = arith.constant 0 : index
      %c0_16 = arith.constant 0 : index
      %18 = vector.load %arg7[%c0_15, %c0_16] : memref<128x128xf32, #tpu.memory_space<vmem>>, vector<128x128xf32>
      tpu.vector_store %arg7[%c0_15, %c0_16], %17 {strides = array<i32>} : memref<128x128xf32, #tpu.memory_space<vmem>>, vector<128x128xf32>,
    } else {
    }
    %c0 = arith.constant 0 : index
    %c0_1 = arith.constant 0 : index
    %3 = vector.load %arg3[%c0, %c0_1] : memref<128x128xbf16, #tpu.memory_space<vmem>>, vector<128x128xbf16>
    %c0_2 = arith.constant 0 : index
    %c0_3 = arith.constant 0 : index
    %4 = vector.load %arg4[%c0_2, %c0_3] : memref<128x128xbf16, #tpu.memory_space<vmem>>, vector<128x128xbf16>
    %cst = arith.constant dense<0.000000e+00> : vector<128x128xf32>
    %5 = tpu.matmul %3, %4, %cst {dimension_numbers = #tpu.dot_dimension_numbers<[1], [0], [0], [1], [0, 0, 1, 1], [], []>} : vector<128x128xbf16>, vector<128x128xbf16>, vector<128x128xf32> -> vector<128x128xf32>
    %6 = arith.truncf %5 : vector<128x128xf32> to vector<128x128xbf16>
    %c0_4 = arith.constant 0 : index
    %c0_5 = arith.constant 0 : index
    %7 = vector.load %arg7[%c0_4, %c0_5] : memref<128x128xf32, #tpu.memory_space<vmem>>, vector<128x128xf32>
    %c0_6 = arith.constant 0 : index
    %c0_7 = arith.constant 0 : index
    %8 = vector.load %arg2[%c0_6, %c0_7] : memref<128x128xbf16, #tpu.memory_space<vmem>>, vector<128x128xbf16>
    %cst_8 = arith.constant dense<0.000000e+00> : vector<128x128xf32>
    %9 = tpu.matmul %8, %6, %cst_8 {dimension_numbers = #tpu.dot_dimension_numbers<[1], [0], [0], [1], [0, 0, 1, 1], [], []>} : vector<128x128xbf16>, vector<128x128xbf16>, vector<128x128xf32> -> vector<128x128xf32>
    %10 = arith.addf %7, %9 : vector<128x128xf32>
    %c0_9 = arith.constant 0 : index
    %c0_10 = arith.constant 0 : index
    %11 = vector.load %arg7[%c0_9, %c0_10] : memref<128x128xf32, #tpu.memory_space<vmem>>, vector<128x128xf32>
    tpu.vector_store %arg7[%c0_9, %c0_10], %10 {strides = array<i32>} : memref<128x128xf32, #tpu.memory_space<vmem>>, vector<128x128xf32>,
    %c0_i32_11 = arith.constant 0 : i32
    %12 = arith.cmpi eq, %arg1, %c0_i32_11 : i32
    %13 = arith.extui %12 : i1 to i32
    %c0_i32_12 = arith.constant 0 : i32
    %14 = arith.cmpi ne, %13, %c0_i32_12 : i32
    scf.if %14 {
      %c0_13 = arith.constant 0 : index
      %c0_14 = arith.constant 0 : index
      %15 = vector.load %arg7[%c0_13, %c0_14] : memref<128x128xf32, #tpu.memory_space<vmem>>, vector<128x128xf32>
      %cst_15 = arith.constant 0.000000e+00 : f32
      %16 = vector.broadcast %cst_15 : f32 to vector<128x128xf32>
      %17 = arith.maximumf %15, %16 : vector<128x128xf32>
      %18 = arith.truncf %17 : vector<128x128xf32> to vector<128x128xbf16>
      %c0_16 = arith.constant 0 : index
      %c0_17 = arith.constant 0 : index
      %19 = vector.load %arg6[%c0_16, %c0_17] : memref<128x128xbf16, #tpu.memory_space<vmem>>, vector<128x128xbf16>
      tpu.vector_store %arg6[%c0_16, %c0_17], %18 {strides = array<i32>} : memref<128x128xbf16, #tpu.memory_space<vmem>>, vector<128x128xbf16>,
    } else {
    }
    return
  }
  func.func @transform_0(%arg0: i32, %arg1: i32) -> (i32, i32) {
    %c0_i32 = arith.constant 0 : i32
    return %arg0, %arg1 : i32, i32
  }
  func.func @transform_1(%arg0: i32, %arg1: i32) -> (i32, i32) {
    %c0_i32 = arith.constant 0 : i32
    %c0_i32_0 = arith.constant 0 : i32
    return %arg1, %c0_i32 : i32, i32
  }
  func.func @transform_2(%arg0: i32, %arg1: i32) -> (i32, i32) {
    %c0_i32 = arith.constant 0 : i32
    %c0_i32_0 = arith.constant 0 : i32
    %c0_i32_1 = arith.constant 0 : i32
    return %c0_i32, %c0_i32_0 : i32, i32
  }
  func.func @transform_3(%arg0: i32, %arg1: i32) -> (i32, i32) {
    %c0_i32 = arith.constant 0 : i32
    %c0_i32_0 = arith.constant 0 : i32
    %c0_i32_1 = arith.constant 0 : i32
    return %c0_i32, %c0_i32_0 : i32, i32
  }
  func.func @transform_4(%arg0: i32, %arg1: i32) -> (i32, i32) {
    %c0_i32 = arith.constant 0 : i32
    %c0_i32_0 = arith.constant 0 : i32
    return %arg0, %c0_i32 : i32, i32
  }
}

module attributes {stable_mosaic.version = 11 : i64} {
  func.func @_readout_softmax_kernel(%arg0: i32, %arg1: memref<128x128xbf16, #tpu.memory_space<vmem>>, %arg2: memref<128x128xbf16, #tpu.memory_space<vmem>>, %arg3: memref<1x128xf32, #tpu.memory_space<vmem>>, %arg4: memref<128x128xf32, #tpu.memory_space<vmem>>) attributes {dimension_semantics = [#tpu.dimension_semantics<parallel>], iteration_bounds = array<i64: 1>, scalar_prefetch = 0 : i64, scratch_operands = 0 : i64, tpu.core_type = #tpu.core_type<tc>, window_params = [{transform_indices = @transform_0, window_bounds = array<i64: 128, 128>}, {pipeline_mode = #tpu.pipeline_mode<synchronous>, transform_indices = @transform_1, window_bounds = array<i64: 128, 128>}, {pipeline_mode = #tpu.pipeline_mode<synchronous>, transform_indices = @transform_2, window_bounds = array<i64: 1, 128>}, {transform_indices = @transform_3, window_bounds = array<i64: 128, 128>}]} {
    %c0 = arith.constant 0 : index
    %c0_0 = arith.constant 0 : index
    %0 = vector.load %arg1[%c0, %c0_0] : memref<128x128xbf16, #tpu.memory_space<vmem>>, vector<128x128xbf16>
    %c0_1 = arith.constant 0 : index
    %c0_2 = arith.constant 0 : index
    %1 = vector.load %arg2[%c0_1, %c0_2] : memref<128x128xbf16, #tpu.memory_space<vmem>>, vector<128x128xbf16>
    %cst = arith.constant dense<0.000000e+00> : vector<128x128xf32>
    %2 = tpu.matmul %0, %1, %cst {dimension_numbers = #tpu.dot_dimension_numbers<[1], [0], [0], [1], [0, 0, 1, 1], [], []>} : vector<128x128xbf16>, vector<128x128xbf16>, vector<128x128xf32> -> vector<128x128xf32>
    %c0_3 = arith.constant 0 : index
    %c0_4 = arith.constant 0 : index
    %3 = vector.load %arg3[%c0_3, %c0_4] : memref<1x128xf32, #tpu.memory_space<vmem>>, vector<1x128xf32>
    %4 = vector.broadcast %3 : vector<1x128xf32> to vector<128x128xf32>
    %5 = arith.addf %2, %4 : vector<128x128xf32>
    %6 = tpu.iota {dimensions = array<i32: 1>} : vector<128x128xi32>
    %c4_i32 = arith.constant 4 : i32
    %7 = vector.broadcast %c4_i32 : i32 to vector<128x128xi32>
    %8 = arith.cmpi slt, %6, %7 : vector<128x128xi32>
    %cst_5 = arith.constant 0xFF800000 : f32
    %9 = vector.broadcast %cst_5 : f32 to vector<128x128xf32>
    %10 = arith.select %8, %5, %9 : vector<128x128xi1>, vector<128x128xf32>
    %cst_6 = arith.constant dense<0xFF800000> : vector<128xf32>
    %11 = vector.multi_reduction <maximumf>, %10, %cst_6 [1] : vector<128x128xf32> to vector<128xf32>
    %12 = vector.shape_cast %11 : vector<128xf32> to vector<128x1xf32>
    %13 = vector.broadcast %12 : vector<128x1xf32> to vector<128x128xf32>
    %14 = arith.subf %10, %13 : vector<128x128xf32>
    %15 = math.exp %14 : vector<128x128xf32>
    %cst_7 = arith.constant dense<0.000000e+00> : vector<128xf32>
    %16 = vector.multi_reduction <add>, %15, %cst_7 [1] : vector<128x128xf32> to vector<128xf32>
    %17 = vector.shape_cast %16 : vector<128xf32> to vector<128x1xf32>
    %18 = vector.broadcast %17 : vector<128x1xf32> to vector<128x128xf32>
    %19 = arith.divf %15, %18 : vector<128x128xf32>
    %c0_8 = arith.constant 0 : index
    %c0_9 = arith.constant 0 : index
    %20 = vector.load %arg4[%c0_8, %c0_9] : memref<128x128xf32, #tpu.memory_space<vmem>>, vector<128x128xf32>
    tpu.vector_store %arg4[%c0_8, %c0_9], %19 {strides = array<i32>} : memref<128x128xf32, #tpu.memory_space<vmem>>, vector<128x128xf32>,
    return
  }
  func.func @transform_0(%arg0: i32) -> (i32, i32) {
    %c0_i32 = arith.constant 0 : i32
    %c0_i32_0 = arith.constant 0 : i32
    return %arg0, %c0_i32 : i32, i32
  }
  func.func @transform_1(%arg0: i32) -> (i32, i32) {
    %c0_i32 = arith.constant 0 : i32
    %c0_i32_0 = arith.constant 0 : i32
    %c0_i32_1 = arith.constant 0 : i32
    return %c0_i32, %c0_i32_0 : i32, i32
  }
  func.func @transform_2(%arg0: i32) -> (i32, i32) {
    %c0_i32 = arith.constant 0 : i32
    %c0_i32_0 = arith.constant 0 : i32
    %c0_i32_1 = arith.constant 0 : i32
    return %c0_i32, %c0_i32_0 : i32, i32
  }
  func.func @transform_3(%arg0: i32) -> (i32, i32) {
    %c0_i32 = arith.constant 0 : i32
    %c0_i32_0 = arith.constant 0 : i32
    return %arg0, %c0_i32 : i32, i32
  }
}

</mosaic_0001>

<bundles_post_ra>
// kernel: gcn_forward.3
= control target key start
LH: loop header
LB: loop body
LE: loop exit
PB: predicated region body
PF: predicated region fallthrough
CT: control target
= control target key end

     0   :  { %s766_s2 = inlined_call_operand.vmem [shape: bf16[128,128], index: 2, kind: input, shape index: {}]   ;;  %s767_s1 = inlined_call_operand.vmem [shape: bf16[128,128], index: 1, kind: input, shape index: {}]   ;;  %s768_s3 = inlined_call_operand.vmem [shape: f32[1,128], index: 3, kind: input, shape index: {}]   ;;  %s769_s0 = inlined_call_operand.vmem [shape: bf16[128,128], index: 0, kind: input, shape index: {}]   ;;  %s770_s4 = inlined_call_operand.vmem [shape: bf16[128,128], index: 4, kind: output, shape index: {}]  }
   0x1   :  { %v569_v0 = vld [vmem:[%s766_s2 + $0x38] sm:$0xff]  ;;  %v568_v1 = vld [vmem:[%s766_s2 + $0x30] sm:$0xff]  ;;  %v567_v2 = vld [vmem:[%s766_s2 + $0x28] sm:$0xff] }
   0x2   :  { %625 = vmatpush.bf16.msra.mxu2 %v569_v0  ;;  %169 = vmatpush.bf16.msra.mxu0 %v569_v0  ;;  %v566_v3 = vld [vmem:[%s766_s2 + $0x20] sm:$0xff]  ;;  %v565_v4 = vld [vmem:[%s766_s2 + $0x18] sm:$0xff]  ;;  %v564_v5 = vld [vmem:[%s766_s2 + $0x10] sm:$0xff] }
   0x3   :  { %v563_v6 = vld [vmem:[%s766_s2 + $0x8] sm:$0xff]  ;;  %v562_v7 = vld [vmem:[%s766_s2] sm:$0xff]  ;;  %v560_v12 = vld [vmem:[%s767_s1 + $0x30] sm:$0xff] }
   0x4   :  { %v558_v8 = vld [vmem:[%s767_s1 + $0x20] sm:$0xff]  ;;  %v559_v10 = vld [vmem:[%s767_s1 + $0x28] sm:$0xff]  ;;  %v556_v13 = vld [vmem:[%s767_s1 + $0x10] sm:$0xff] }
   0x5   :  { %v554_v9 = vld [vmem:[%s767_s1] sm:$0xff]  ;;  %v555_v11 = vld [vmem:[%s767_s1 + $0x8] sm:$0xff]  ;;  %v561_v14 = vld [vmem:[%s767_s1 + $0x38] sm:$0xff] }
   0x6   :  { %626 = vmatpush.bf16.msra.mxu2 %v568_v1  ;;  %170 = vmatpush.bf16.msra.mxu0 %v568_v1  ;;  %v557_v15 = vld [vmem:[%s767_s1 + $0x18] sm:$0xff]  ;;  %v570_v40 = vld [vmem:[%s769_s0] sm:$0xff]  ;;  %v571_v42 = vld [vmem:[%s769_s0 + $0x8] sm:$0xff] }
   0x7   :  { %v574_v41 = vld [vmem:[%s769_s0 + $0x20] sm:$0xff]  ;;  %v575_v43 = vld [vmem:[%s769_s0 + $0x28] sm:$0xff]  ;;  %v572_v44 = vld [vmem:[%s769_s0 + $0x10] sm:$0xff] }
   0x8   :  { %v576_v45 = vld [vmem:[%s769_s0 + $0x30] sm:$0xff]  ;;  %v573_v46 = vld [vmem:[%s769_s0 + $0x18] sm:$0xff]  ;;  %v641_v49 = vld [vmem:[%s768_s3] ss:$0 sm:$0xff] }
   0x9   :  { %v577_v47 = vld [vmem:[%s769_s0 + $0x38] sm:$0xff] }
   0xa   :  { %627 = vmatpush.bf16.msra.mxu2 %v567_v2  ;;  %171 = vmatpush.bf16.msra.mxu0 %v567_v2 }
   0xe   :  { %628 = vmatpush.bf16.msra.mxu2 %v566_v3  ;;  %172 = vmatpush.bf16.msra.mxu0 %v566_v3 }
  0x12   :  { %629 = vmatpush.bf16.msra.mxu2 %v565_v4  ;;  %173 = vmatpush.bf16.msra.mxu0 %v565_v4 }
  0x16   :  { %630 = vmatpush.bf16.msra.mxu2 %v564_v5  ;;  %174 = vmatpush.bf16.msra.mxu0 %v564_v5 }
  0x1a   :  { %631 = vmatpush.bf16.msra.mxu2 %v563_v6  ;;  %175 = vmatpush.bf16.msra.mxu0 %v563_v6 }
  0x1e   :  { %632 = vmatpush.bf16.msra.mxu2 %v562_v7  ;;  %176 = vmatpush.bf16.msra.mxu0 %v562_v7 }
  0x21   :  { %197 = vmatmul.bf16.vlgmr.msra.gmra.mxu2 %v558_v8  ;;  %177 = vmatmul.bf16.vlgmr.msra.gmra.mxu0 %v554_v9 }
  0x31   :  { %202 = vmatmul.bf16.gmra.mxu2 %v559_v10  ;;  %182 = vmatmul.bf16.gmra.mxu0 %v555_v11 }
  0x41   :  { %207 = vmatmul.bf16.gmra.mxu2 %v560_v12  ;;  %187 = vmatmul.bf16.gmra.mxu0 %v556_v13 }
  0x51   :  { %212 = vmatmul.bf16.gmra.mxu2 %v561_v14  ;;  %192 = vmatmul.bf16.gmra.mxu0 %v557_v15 }
  0x9e   :  { %v178_v17 = vpop.f32.mrf.mxu0 }
  0xa4   :  { %v198_v16 = vpop.f32.mrf.mxu2 }
  0xa6   :  { %v180_v19 = vpop.f32.mrf.mxu0 }
  0xa7   :  { %v218_v39 = vpack.c.bf16 %v180_v19, %v178_v17 }
  0xac   :  { %v200_v18 = vpop.f32.mrf.mxu2 }
  0xad   :  { %v222_v34 = vpack.c.bf16 %v200_v18, %v198_v16 }
  0xae   :  { %v183_v21 = vpop.f32.mrf.mxu0 }
  0xb4   :  { %v203_v20 = vpop.f32.mrf.mxu2 }
  0xb6   :  { %v185_v23 = vpop.f32.mrf.mxu0 }
  0xb7   :  { %v219_v38 = vpack.c.bf16 %v185_v23, %v183_v21 }
  0xbc   :  { %v205_v22 = vpop.f32.mrf.mxu2 }
  0xbd   :  { %v223_v33 = vpack.c.bf16 %v205_v22, %v203_v20 }
  0xbe   :  { %v188_v25 = vpop.f32.mrf.mxu0 }
  0xc4   :  { %v208_v24 = vpop.f32.mrf.mxu2 }
  0xc6   :  { %v190_v28 = vpop.f32.mrf.mxu0 }
  0xc7   :  { %v220_v37 = vpack.c.bf16 %v190_v28, %v188_v25 }
  0xcc   :  { %v210_v26 = vpop.f32.mrf.mxu2 }
  0xcd   :  { %v224_v32 = vpack.c.bf16 %v210_v26, %v208_v24 }
  0xce   :  { %v193_v31 = vpop.f32.mrf.mxu0 }
  0xd4   :  { %v213_v27 = vpop.f32.mrf.mxu2 }
  0xd6   :  { %v195_v35 = vpop.f32.mrf.mxu0 }
  0xd7   :  { %v221_v36 = vpack.c.bf16 %v195_v35, %v193_v31 }
  0xdc   :  { %v215_v29 = vpop.f32.mrf.mxu2 }
  0xdd   :  { %v225_v30 = vpack.c.bf16 %v215_v29, %v213_v27 }
  0xdf   :  { %306 = vmatpush.bf16.msra.mxu1 %v225_v30  ;;  %633 = vmatpush.bf16.msra.mxu3 %v225_v30 }
  0xe3   :  { %307 = vmatpush.bf16.msra.mxu1 %v224_v32  ;;  %634 = vmatpush.bf16.msra.mxu3 %v224_v32 }
  0xe7   :  { %308 = vmatpush.bf16.msra.mxu1 %v223_v33  ;;  %635 = vmatpush.bf16.msra.mxu3 %v223_v33 }
  0xeb   :  { %309 = vmatpush.bf16.msra.mxu1 %v222_v34  ;;  %636 = vmatpush.bf16.msra.mxu3 %v222_v34 }
  0xef   :  { %310 = vmatpush.bf16.msra.mxu1 %v221_v36  ;;  %637 = vmatpush.bf16.msra.mxu3 %v221_v36 }
  0xf3   :  { %311 = vmatpush.bf16.msra.mxu1 %v220_v37  ;;  %638 = vmatpush.bf16.msra.mxu3 %v220_v37 }
  0xf7   :  { %312 = vmatpush.bf16.msra.mxu1 %v219_v38  ;;  %639 = vmatpush.bf16.msra.mxu3 %v219_v38 }
  0xfb   :  { %313 = vmatpush.bf16.msra.mxu1 %v218_v39  ;;  %640 = vmatpush.bf16.msra.mxu3 %v218_v39 }
  0xfe   :  { %314 = vmatmul.bf16.vlgmr.msra.gmra.mxu1 %v570_v40  ;;  %334 = vmatmul.bf16.vlgmr.msra.gmra.mxu3 %v574_v41 }
 0x10e   :  { %319 = vmatmul.bf16.gmra.mxu1 %v571_v42  ;;  %339 = vmatmul.bf16.gmra.mxu3 %v575_v43 }
 0x11e   :  { %324 = vmatmul.bf16.gmra.mxu1 %v572_v44  ;;  %344 = vmatmul.bf16.gmra.mxu3 %v576_v45 }
 0x12e   :  { %329 = vmatmul.bf16.gmra.mxu1 %v573_v46  ;;  %349 = vmatmul.bf16.gmra.mxu3 %v577_v47 }
 0x17b   :  { %v315_v48 = vpop.f32.mrf.mxu1 }
 0x17c   :  { %v355_v51 = vadd.f32 %v641_v49, %v315_v48 }
 0x17e   :  { %v406_v54 = vmax.f32 %v355_v51, 0.0 }
 0x181   :  { %v335_v50 = vpop.f32.mrf.mxu3 }
 0x182   :  { %v363_v56 = vadd.f32 %v641_v49, %v335_v50 }
 0x183   :  { %v317_v52 = vpop.f32.mrf.mxu1 }
 0x184   :  { %v356_v53 = vadd.f32 %v641_v49, %v317_v52  ;;  %v414_v61 = vmax.f32 %v363_v56, 0.0 }
 0x186   :  { %v407_v55 = vmax.f32 %v356_v53, 0.0 }
 0x188   :  { %v581_v57 = vpack.c.bf16 %v407_v55, %v406_v54 }
 0x189   :  { %v337_v58 = vpop.f32.mrf.mxu3 }
 0x18a   :  { %582 = vst [vmem:[%s770_s4] sm:$0xff] %v581_v57   ;;  %v364_v59 = vadd.f32 %v641_v49, %v337_v58 }
 0x18b   :  { %v320_v60 = vpop.f32.mrf.mxu1 }
 0x18c   :  { %v415_v62 = vmax.f32 %v364_v59, 0.0  ;;  %v357_v1 = vadd.f32 %v641_v49, %v320_v60 }
 0x18e   :  { %v601_v63 = vpack.c.bf16 %v415_v62, %v414_v61  ;;  %v408_v4 = vmax.f32 %v357_v1, 0.0 }
 0x190   :  { %621 = vst [vmem:[%s770_s4 + $0x20] sm:$0xff] %v601_v63  }
 0x191   :  { %v340_v0 = vpop.f32.mrf.mxu3 }
 0x192   :  { %v365_v6 = vadd.f32 %v641_v49, %v340_v0 }
 0x193   :  { %v322_v2 = vpop.f32.mrf.mxu1 }
 0x194   :  { %v358_v3 = vadd.f32 %v641_v49, %v322_v2  ;;  %v416_v11 = vmax.f32 %v365_v6, 0.0 }
 0x196   :  { %v409_v5 = vmax.f32 %v358_v3, 0.0 }
 0x198   :  { %v586_v7 = vpack.c.bf16 %v409_v5, %v408_v4 }
 0x199   :  { %v342_v8 = vpop.f32.mrf.mxu3 }
 0x19a   :  { %618 = vst [vmem:[%s770_s4 + $0x8] sm:$0xff] %v586_v7   ;;  %v366_v9 = vadd.f32 %v641_v49, %v342_v8 }
 0x19b   :  { %v325_v10 = vpop.f32.mrf.mxu1 }
 0x19c   :  { %v417_v12 = vmax.f32 %v366_v9, 0.0  ;;  %v359_v15 = vadd.f32 %v641_v49, %v325_v10 }
 0x19e   :  { %v606_v13 = vpack.c.bf16 %v417_v12, %v416_v11  ;;  %v410_v18 = vmax.f32 %v359_v15, 0.0 }
 0x1a0   :  { %622 = vst [vmem:[%s770_s4 + $0x28] sm:$0xff] %v606_v13  }
 0x1a1   :  { %v345_v14 = vpop.f32.mrf.mxu3 }
 0x1a2   :  { %v367_v20 = vadd.f32 %v641_v49, %v345_v14 }
 0x1a3   :  { %v327_v16 = vpop.f32.mrf.mxu1 }
 0x1a4   :  { %v360_v17 = vadd.f32 %v641_v49, %v327_v16  ;;  %v418_v25 = vmax.f32 %v367_v20, 0.0 }
 0x1a6   :  { %v411_v19 = vmax.f32 %v360_v17, 0.0 }
 0x1a8   :  { %v591_v21 = vpack.c.bf16 %v411_v19, %v410_v18 }
 0x1a9   :  { %v347_v22 = vpop.f32.mrf.mxu3 }
 0x1aa   :  { %619 = vst [vmem:[%s770_s4 + $0x10] sm:$0xff] %v591_v21   ;;  %v368_v23 = vadd.f32 %v641_v49, %v347_v22 }
 0x1ab   :  { %v330_v24 = vpop.f32.mrf.mxu1 }
 0x1ac   :  { %v419_v26 = vmax.f32 %v368_v23, 0.0  ;;  %v361_v29 = vadd.f32 %v641_v49, %v330_v24 }
 0x1ae   :  { %v611_v27 = vpack.c.bf16 %v419_v26, %v418_v25  ;;  %v412_v32 = vmax.f32 %v361_v29, 0.0 }
 0x1b0   :  { %623 = vst [vmem:[%s770_s4 + $0x30] sm:$0xff] %v611_v27  }
 0x1b1   :  { %v350_v28 = vpop.f32.mrf.mxu3 }
 0x1b2   :  { %v369_v34 = vadd.f32 %v641_v49, %v350_v28 }
 0x1b3   :  { %v332_v30 = vpop.f32.mrf.mxu1 }
 0x1b4   :  { %v362_v31 = vadd.f32 %v641_v49, %v332_v30  ;;  %v420_v38 = vmax.f32 %v369_v34, 0.0 }
 0x1b6   :  { %v413_v33 = vmax.f32 %v362_v31, 0.0 }
 0x1b8   :  { %v596_v35 = vpack.c.bf16 %v413_v33, %v412_v32 }
 0x1b9   :  { %v352_v36 = vpop.f32.mrf.mxu3 }
 0x1ba   :  { %620 = vst [vmem:[%s770_s4 + $0x18] sm:$0xff] %v596_v35   ;;  %v370_v37 = vadd.f32 %v641_v49, %v352_v36 }
 0x1bc   :  { %v421_v39 = vmax.f32 %v370_v37, 0.0 }
 0x1be   :  { %v616_v40 = vpack.c.bf16 %v421_v39, %v420_v38 }
 0x1c0   :  { %624 = vst [vmem:[%s770_s4 + $0x38] sm:$0xff] %v616_v40  }

// kernel: gcn_forward.5
= control target key start
LH: loop header
LB: loop body
LE: loop exit
PB: predicated region body
PF: predicated region fallthrough
CT: control target
= control target key end

     0   :  { %v195_v16 = vlaneseq  ;;  %s1192_s1 = inlined_call_operand.vmem [shape: bf16[128,128], index: 1, kind: input, shape index: {}]   ;;  %s1193_s2 = inlined_call_operand.vmem [shape: f32[1,128], index: 2, kind: input, shape index: {}]   ;;  %s1194_s0 = inlined_call_operand.vmem [shape: bf16[128,128], index: 0, kind: input, shape index: {}]   ;;  %s1195_s3 = inlined_call_operand.vmem [shape: f32[128,128], index: 3, kind: output, shape index: {}]  }
   0x1   :  { %v665_v0 = vld [vmem:[%s1192_s1 + $0x38] sm:$0xff]  ;;  %v664_v1 = vld [vmem:[%s1192_s1 + $0x30] sm:$0xff]  ;;  %v663_v2 = vld [vmem:[%s1192_s1 + $0x28] sm:$0xff] }
   0x2   :  { %146 = vmatpush.bf16.msra.mxu0 %v665_v0  ;;  %666 = vmatpush.bf16.msra.mxu1 %v665_v0  ;;  %v662_v3 = vld [vmem:[%s1192_s1 + $0x20] sm:$0xff]  ;;  %v661_v4 = vld [vmem:[%s1192_s1 + $0x18] sm:$0xff]  ;;  %v660_v5 = vld [vmem:[%s1192_s1 + $0x10] sm:$0xff]  ;;  %v823_v17 = vand.u32 127, %v195_v16 }
   0x3   :  { %667 = vmatpush.bf16.msra.mxu2 %v665_v0  ;;  %668 = vmatpush.bf16.msra.mxu3 %v665_v0  ;;  %v659_v6 = vld [vmem:[%s1192_s1 + $0x8] sm:$0xff]  ;;  %v658_v7 = vld [vmem:[%s1192_s1] sm:$0xff]  ;;  %v652_v9 = vld [vmem:[%s1194_s0 + $0x10] sm:$0xff] }
   0x4   :  { %v650_v8 = vld [vmem:[%s1194_s0] sm:$0xff]  ;;  %v656_v11 = vld [vmem:[%s1194_s0 + $0x30] sm:$0xff]  ;;  %v651_v12 = vld [vmem:[%s1194_s0 + $0x8] sm:$0xff]  ;;  %vm197_vm0 = vcmp.lt.s32.totalorder %v823_v17, 4 }
   0x5   :  { %v654_v10 = vld [vmem:[%s1194_s0 + $0x20] sm:$0xff]  ;;  %v653_v13 = vld [vmem:[%s1194_s0 + $0x18] sm:$0xff]  ;;  %v655_v14 = vld [vmem:[%s1194_s0 + $0x28] sm:$0xff] }
   0x6   :  { %147 = vmatpush.bf16.msra.mxu0 %v664_v1  ;;  %669 = vmatpush.bf16.msra.mxu1 %v664_v1  ;;  %v657_v15 = vld [vmem:[%s1194_s0 + $0x38] sm:$0xff]  ;;  %v828_v18 = vld [vmem:[%s1193_s2] ss:$0 sm:$0xff] }
   0x7   :  { %670 = vmatpush.bf16.msra.mxu2 %v664_v1  ;;  %671 = vmatpush.bf16.msra.mxu3 %v664_v1 }
   0xa   :  { %148 = vmatpush.bf16.msra.mxu0 %v663_v2  ;;  %672 = vmatpush.bf16.msra.mxu1 %v663_v2 }
   0xb   :  { %673 = vmatpush.bf16.msra.mxu2 %v663_v2  ;;  %674 = vmatpush.bf16.msra.mxu3 %v663_v2 }
   0xe   :  { %149 = vmatpush.bf16.msra.mxu0 %v662_v3  ;;  %675 = vmatpush.bf16.msra.mxu1 %v662_v3 }
   0xf   :  { %676 = vmatpush.bf16.msra.mxu2 %v662_v3  ;;  %677 = vmatpush.bf16.msra.mxu3 %v662_v3 }
  0x12   :  { %150 = vmatpush.bf16.msra.mxu0 %v661_v4  ;;  %678 = vmatpush.bf16.msra.mxu1 %v661_v4 }
  0x13   :  { %679 = vmatpush.bf16.msra.mxu2 %v661_v4  ;;  %680 = vmatpush.bf16.msra.mxu3 %v661_v4 }
  0x16   :  { %151 = vmatpush.bf16.msra.mxu0 %v660_v5  ;;  %681 = vmatpush.bf16.msra.mxu1 %v660_v5 }
  0x17   :  { %682 = vmatpush.bf16.msra.mxu2 %v660_v5  ;;  %683 = vmatpush.bf16.msra.mxu3 %v660_v5 }
  0x1a   :  { %152 = vmatpush.bf16.msra.mxu0 %v659_v6  ;;  %684 = vmatpush.bf16.msra.mxu1 %v659_v6 }
  0x1b   :  { %685 = vmatpush.bf16.msra.mxu2 %v659_v6  ;;  %686 = vmatpush.bf16.msra.mxu3 %v659_v6 }
  0x1e   :  { %153 = vmatpush.bf16.msra.mxu0 %v658_v7  ;;  %687 = vmatpush.bf16.msra.mxu1 %v658_v7 }
  0x1f   :  { %688 = vmatpush.bf16.msra.mxu2 %v658_v7  ;;  %689 = vmatpush.bf16.msra.mxu3 %v658_v7 }
  0x21   :  { %154 = vmatmul.bf16.vlgmr.msra.gmra.mxu0 %v650_v8  ;;  %164 = vmatmul.bf16.vlgmr.msra.gmra.mxu1 %v652_v9 }
  0x22   :  { %174 = vmatmul.bf16.vlgmr.msra.gmra.mxu2 %v654_v10  ;;  %184 = vmatmul.bf16.vlgmr.msra.gmra.mxu3 %v656_v11 }
  0x31   :  { %159 = vmatmul.bf16.gmra.mxu0 %v651_v12  ;;  %169 = vmatmul.bf16.gmra.mxu1 %v653_v13 }
  0x32   :  { %179 = vmatmul.bf16.gmra.mxu2 %v655_v14  ;;  %189 = vmatmul.bf16.gmra.mxu3 %v657_v15 }
  0x9e   :  { %v155_v19 = vpop.f32.mrf.mxu0  ;;  %v165_v20 = vpop.f32.mrf.mxu1 }
  0x9f   :  { %v156_v21 = vadd.f32 %v828_v18, %v155_v19  ;;  %v166_v22 = vadd.f32 %v828_v18, %v165_v20 }
  0xa1   :  { %v835_v23 = vsel %vm197_vm0, %v166_v22, -inf  ;;  %v839_v24 = vsel %vm197_vm0, %v156_v21, -inf }
  0xa2   :  { %222 = vmax.xlane.f32.xlu2 %v835_v23  ;;  %214 = vmax.xlane.f32.xlu0 %v839_v24 }
  0xa5   :  { %v175_v25 = vpop.f32.mrf.mxu2  ;;  %v185_v26 = vpop.f32.mrf.mxu3 }
  0xa6   :  { %v176_v27 = vadd.f32 %v828_v18, %v175_v25  ;;  %v186_v28 = vadd.f32 %v828_v18, %v185_v26  ;;  %v157_v29 = vpop.f32.mrf.mxu0  ;;  %v167_v32 = vpop.f32.mrf.mxu1 }
  0xa7   :  { %v168_v33 = vadd.f32 %v828_v18, %v167_v32  ;;  %v158_v35 = vadd.f32 %v828_v18, %v157_v29 }
  0xa8   :  { %v847_v30 = vsel %vm197_vm0, %v176_v27, -inf  ;;  %v851_v31 = vsel %vm197_vm0, %v186_v28, -inf }
  0xa9   :  { %v860_v39 = vsel %vm197_vm0, %v168_v33, -inf  ;;  %v870_v41 = vsel %vm197_vm0, %v158_v35, -inf }
  0xaa   :  { %230 = vmax.xlane.f32.xlu2 %v847_v30  ;;  %238 = vmax.xlane.f32.xlu0 %v851_v31 }
  0xad   :  { %v177_v34 = vpop.f32.mrf.mxu2  ;;  %v187_v37 = vpop.f32.mrf.mxu3 }
  0xae   :  { %v160_v36 = vpop.f32.mrf.mxu0  ;;  %v178_v43 = vadd.f32 %v828_v18, %v177_v34  ;;  %v170_v46 = vpop.f32.mrf.mxu1  ;;  %v188_v1 = vadd.f32 %v828_v18, %v187_v37 }
  0xaf   :  { %v161_v38 = vadd.f32 %v828_v18, %v160_v36  ;;  %v171_v50 = vadd.f32 %v828_v18, %v170_v46 }
  0xb0   :  { %v882_v49 = vsel %vm197_vm0, %v178_v43, -inf  ;;  %v924_v2 = vsel %vm197_vm0, %v188_v1, -inf }
  0xb1   :  { %v864_v40 = vsel %vm197_vm0, %v161_v38, -inf  ;;  %v894_v55 = vsel %vm197_vm0, %v171_v50, -inf }
  0xb2   :  { %224 = vmax.xlane.f32.xlu2 %v860_v39  ;;  %218 = vmax.xlane.f32.xlu1 %v864_v40 }
  0xb3   :  { %216 = vmax.xlane.f32.xlu0 %v870_v41 }
  0xb5   :  { %v180_v42 = vpop.f32.mrf.mxu2  ;;  %v190_v45 = vpop.f32.mrf.mxu3 }
  0xb6   :  { %v181_v44 = vadd.f32 %v828_v18, %v180_v42  ;;  %v162_v48 = vpop.f32.mrf.mxu0  ;;  %v172_v58 = vpop.f32.mrf.mxu1  ;;  %v191_v59 = vadd.f32 %v828_v18, %v190_v45 }
  0xb7   :  { %v163_v51 = vadd.f32 %v828_v18, %v162_v48  ;;  %v173_v61 = vadd.f32 %v828_v18, %v172_v58 }
  0xb8   :  { %v877_v47 = vsel %vm197_vm0, %v181_v44, -inf  ;;  %v908_v62 = vsel %vm197_vm0, %v191_v59, -inf }
  0xb9   :  { %v899_v56 = vsel %vm197_vm0, %v163_v51, -inf  ;;  %v917_v0 = vsel %vm197_vm0, %v173_v61, -inf }
  0xba   :  { %234 = vmax.xlane.f32.xlu1 %v877_v47 }
  0xbb   :  { %232 = vmax.xlane.f32.xlu0 %v882_v49 }
  0xbd   :  { %v182_v52 = vpop.f32.mrf.mxu2  ;;  %v192_v57 = vpop.f32.mrf.mxu3 }
  0xbe   :  { %v183_v53 = vadd.f32 %v828_v18, %v182_v52  ;;  %v193_v60 = vadd.f32 %v828_v18, %v192_v57 }
  0xc0   :  { %v890_v54 = vsel %vm197_vm0, %v183_v53, -inf  ;;  %v912_v63 = vsel %vm197_vm0, %v193_v60, -inf }
  0xc1   :  { %236 = vmax.xlane.f32.xlu2 %v890_v54 }
  0xc2   :  { %220 = vmax.xlane.f32.xlu1 %v899_v56 }
  0xc3   :  { %226 = vmax.xlane.f32.xlu0 %v894_v55 }
  0xc9   :  { %242 = vmax.xlane.f32.xlu2 %v908_v62 }
  0xca   :  { %228 = vmax.xlane.f32.xlu1 %v917_v0 }
  0xcb   :  { %244 = vmax.xlane.f32.xlu0 %v912_v63 }
  0xd2   :  { %240 = vmax.xlane.f32.xlu1 %v924_v2 }
 0x115   :  { %v223_v3 = vpop.xlane.xlu2 %222  ;;  %v215_v4 = vpop.xlane.xlu0 %214 }
 0x116   :  { %v250_v5 = vsub.f32 %v835_v23, %v223_v3  ;;  %v246_v6 = vsub.f32 %v839_v24, %v215_v4 }
 0x118   :  { %v270_v7 = vmul.f32 1.442695, %v250_v5  ;;  %v262_v8 = vmul.f32 1.442695, %v246_v6 }
 0x11a   :  { %691 = vpow2.f32 %v270_v7 }
 0x11b   :  { %693 = vpow2.f32 %v262_v8 }
 0x11d   :  { %v231_v9 = vpop.xlane.xlu2 %230  ;;  %v239_v10 = vpop.xlane.xlu0 %238 }
 0x11e   :  { %v254_v11 = vsub.f32 %v847_v30, %v231_v9  ;;  %v258_v12 = vsub.f32 %v851_v31, %v239_v10 }
 0x120   :  { %v931_v13 = vpop.eup %691  ;;  %v278_v14 = vmul.f32 1.442695, %v254_v11  ;;  %v286_v15 = vmul.f32 1.442695, %v258_v12 }
 0x121   :  { %v933_v16 = vpop.eup %693  ;;  %302 = vadd.xlane.f32.xlu2 %v931_v13 }
 0x122   :  { %695 = vpow2.f32 %v278_v14  ;;  %294 = vadd.xlane.f32.xlu1 %v933_v16 }
 0x123   :  { %697 = vpow2.f32 %v286_v15 }
 0x125   :  { %v225_v17 = vpop.xlane.xlu2 %224  ;;  %v219_v18 = vpop.xlane.xlu1 %218 }
 0x126   :  { %v251_v19 = vsub.f32 %v860_v39, %v225_v17  ;;  %v217_v20 = vpop.xlane.xlu0 %216  ;;  %v248_v25 = vsub.f32 %v864_v40, %v219_v18 }
 0x127   :  { %v247_v21 = vsub.f32 %v870_v41, %v217_v20 }
 0x128   :  { %v939_v22 = vpop.eup %695  ;;  %v272_v23 = vmul.f32 1.442695, %v251_v19  ;;  %v266_v27 = vmul.f32 1.442695, %v248_v25 }
 0x129   :  { %v941_v24 = vpop.eup %697  ;;  %v264_v26 = vmul.f32 1.442695, %v247_v21  ;;  %310 = vadd.xlane.f32.xlu0 %v939_v22 }
 0x12a   :  { %699 = vpow2.f32 %v272_v23  ;;  %318 = vadd.xlane.f32.xlu1 %v941_v24 }
 0x12b   :  { %701 = vpow2.f32 %v264_v26 }
 0x12c   :  { %703 = vpow2.f32 %v266_v27 }
 0x12d   :  { %v235_v28 = vpop.xlane.xlu1 %234 }
 0x12e   :  { %v256_v29 = vsub.f32 %v877_v47, %v235_v28  ;;  %v233_v30 = vpop.xlane.xlu0 %232 }
 0x12f   :  { %v255_v31 = vsub.f32 %v882_v49, %v233_v30 }
 0x130   :  { %v948_v32 = vpop.eup %699  ;;  %v282_v33 = vmul.f32 1.442695, %v256_v29 }
 0x131   :  { %v280_v34 = vmul.f32 1.442695, %v255_v31  ;;  %304 = vadd.xlane.f32.xlu0 %v948_v32  ;;  %v951_v35 = vpop.eup %701 }
 0x132   :  { %705 = vpow2.f32 %v282_v33  ;;  %296 = vadd.xlane.f32.xlu2 %v951_v35  ;;  %v955_v40 = vpop.eup %703 }
 0x133   :  { %707 = vpow2.f32 %v280_v34 }
 0x134   :  { %v237_v36 = vpop.xlane.xlu2 %236 }
 0x135   :  { %v257_v37 = vsub.f32 %v890_v54, %v237_v36  ;;  %v221_v38 = vpop.xlane.xlu1 %220 }
 0x136   :  { %v227_v39 = vpop.xlane.xlu0 %226  ;;  %v249_v46 = vsub.f32 %v899_v56, %v221_v38 }
 0x137   :  { %v284_v41 = vmul.f32 1.442695, %v257_v37  ;;  %v252_v42 = vsub.f32 %v894_v55, %v227_v39 }
 0x138   :  { %v958_v43 = vpop.eup %705  ;;  %v268_v51 = vmul.f32 1.442695, %v249_v46 }
 0x139   :  { %v960_v44 = vpop.eup %707  ;;  %v274_v45 = vmul.f32 1.442695, %v252_v42  ;;  %298 = vadd.xlane.f32.xlu0 %v955_v40  ;;  %709 = vpow2.f32 %v284_v41 }
 0x13a   :  { %312 = vadd.xlane.f32.xlu1 %v960_v44  ;;  %314 = vadd.xlane.f32.xlu2 %v958_v43 }
 0x13b   :  { %711 = vpow2.f32 %v274_v45 }
 0x13c   :  { %v243_v47 = vpop.xlane.xlu2 %242 }
 0x13d   :  { %v260_v48 = vsub.f32 %v908_v62, %v243_v47  ;;  %v229_v49 = vpop.xlane.xlu1 %228 }
 0x13e   :  { %v253_v50 = vsub.f32 %v917_v0, %v229_v49  ;;  %v245_v55 = vpop.xlane.xlu0 %244 }
 0x13f   :  { %v290_v52 = vmul.f32 1.442695, %v260_v48  ;;  %v968_v53 = vpop.eup %709  ;;  %v261_v56 = vsub.f32 %v912_v63, %v245_v55 }
 0x140   :  { %v276_v54 = vmul.f32 1.442695, %v253_v50 }
 0x141   :  { %v970_v57 = vpop.eup %711  ;;  %713 = vpow2.f32 %v290_v52  ;;  %316 = vadd.xlane.f32.xlu0 %v968_v53  ;;  %v292_v61 = vmul.f32 1.442695, %v261_v56 }
 0x142   :  { %715 = vpow2.f32 %v276_v54  ;;  %306 = vadd.xlane.f32.xlu1 %v970_v57 }
 0x143   :  { %717 = vpow2.f32 %v268_v51 }
 0x145   :  { %v241_v58 = vpop.xlane.xlu1 %240 }
 0x146   :  { %v259_v59 = vsub.f32 %v924_v2, %v241_v58 }
 0x147   :  { %v976_v60 = vpop.eup %713 }
 0x148   :  { %v978_v62 = vpop.eup %715  ;;  %v288_v0 = vmul.f32 1.442695, %v259_v59 }
 0x149   :  { %v980_v1 = vpop.eup %717  ;;  %322 = vadd.xlane.f32.xlu0 %v976_v60  ;;  %308 = vadd.xlane.f32.xlu2 %v978_v62 }
 0x14a   :  { %719 = vpow2.f32 %v288_v0  ;;  %300 = vadd.xlane.f32.xlu1 %v980_v1 }
 0x14b   :  { %721 = vpow2.f32 %v292_v61 }
 0x150   :  { %v985_v63 = vpop.eup %719 }
 0x151   :  { %v987_v3 = vpop.eup %721  ;;  %320 = vadd.xlane.f32.xlu2 %v985_v63 }
 0x152   :  { %324 = vadd.xlane.f32.xlu1 %v987_v3 }
 0x194   :  { %v303_v2 = vpop.xlane.xlu2 %302 }
 0x195   :  { %723 = vrcp.f32 %v303_v2  ;;  %v295_v4 = vpop.xlane.xlu1 %294  ;;  %v397_v12 = vand.u32 2147483648, %v303_v2  ;;  %v395_v17 = vand.u32 2147483647, %v303_v2  ;;  %vm391_vm3 = vweird.f32 %v303_v2 }
 0x196   :  { %725 = vrcp.f32 %v295_v4  ;;  %v337_v18 = vand.u32 2147483648, %v295_v4  ;;  %v335_v20 = vand.u32 2147483647, %v295_v4  ;;  %vm331_vm5 = vweird.f32 %v295_v4 }
 0x197   :  { %v398_v25 = vor.u32 1.1754944e-38, %v397_v12  ;;  %vm396_vm6 = vcmp.eq.f32.partialorder %v395_v17, 8.507059e+37 }
 0x198   :  { %v338_v29 = vor.u32 1.1754944e-38, %v337_v18  ;;  %vm336_vm8 = vcmp.eq.f32.partialorder %v335_v20, 8.507059e+37 }
 0x19b   :  { %v724_v5 = vpop.eup %723 }
 0x19c   :  { %v726_v6 = vpop.eup %725  ;;  %v387_v7 = vmul.f32 %v724_v5, %v303_v2  ;;  %v991_v8 = vpop.xlane.xlu0 %310  ;;  %vm392_vm1 = vweird.f32 %v724_v5 }
 0x19d   :  { %v327_v9 = vmul.f32 %v726_v6, %v295_v4  ;;  %v993_v10 = vpop.xlane.xlu1 %318  ;;  %727 = vrcp.f32 %v991_v8  ;;  %vm332_vm2 = vweird.f32 %v726_v6  ;;  %vm393_vm4 = vmor %vm391_vm3, %vm392_vm1  ;;  %v457_v46 = vand.u32 2147483648, %v991_v8 }
 0x19e   :  { %v388_v11 = vsub.f32 1.0, %v387_v7  ;;  %729 = vrcp.f32 %v993_v10  ;;  %vm333_vm7 = vmor %vm331_vm5, %vm332_vm2  ;;  %v517_v47 = vand.u32 2147483648, %v993_v10  ;;  %v455_v48 = vand.u32 2147483647, %v991_v8 }
 0x19f   :  { %v328_v14 = vsub.f32 1.0, %v327_v9  ;;  %v515_v49 = vand.u32 2147483647, %v993_v10  ;;  %vm451_vm11 = vweird.f32 %v991_v8  ;;  %vm511_vm12 = vweird.f32 %v993_v10 }
 0x1a0   :  { %v389_v15 = vmul.f32 %v724_v5, %v388_v11  ;;  %v458_v52 = vor.u32 1.1754944e-38, %v457_v46  ;;  %v518_v55 = vor.u32 1.1754944e-38, %v517_v47  ;;  %vm456_vm15 = vcmp.eq.f32.partialorder %v455_v48, 8.507059e+37 }
 0x1a1   :  { %v329_v19 = vmul.f32 %v726_v6, %v328_v14  ;;  %vm516_vm0 = vcmp.eq.f32.partialorder %v515_v49, 8.507059e+37 }
 0x1a2   :  { %v390_v21 = vadd.f32 %v724_v5, %v389_v15 }
 0x1a3   :  { %v728_v23 = vpop.eup %727  ;;  %v330_v26 = vadd.f32 %v726_v6, %v329_v19 }
 0x1a4   :  { %v730_v27 = vpop.eup %729  ;;  %v394_v28 = vsel %vm393_vm4, %v724_v5, %v390_v21  ;;  %v447_v30 = vmul.f32 %v728_v23, %v991_v8  ;;  %v998_v31 = vpop.xlane.xlu0 %304  ;;  %vm452_vm9 = vweird.f32 %v728_v23 }
 0x1a5   :  { %v399_v33 = vsel %vm396_vm6, %v398_v25, %v394_v28  ;;  %v334_v34 = vsel %vm333_vm7, %v726_v6, %v330_v26  ;;  %v507_v36 = vmul.f32 %v730_v27, %v993_v10  ;;  %v1002_v41 = vpop.xlane.xlu2 %296  ;;  %731 = vrcp.f32 %v998_v31  ;;  %vm453_vm13 = vmor %vm451_vm11, %vm452_vm9 }
 0x1a6   :  { %v400_v37 = vmul.f32 %v931_v13, %v399_v33  ;;  %v339_v38 = vsel %vm336_vm8, %v338_v29, %v334_v34  ;;  %v448_v39 = vsub.f32 1.0, %v447_v30  ;;  %733 = vrcp.f32 %v1002_v41 }
 0x1a7   :  { %v340_v42 = vmul.f32 %v933_v16, %v339_v38  ;;  %v508_v45 = vsub.f32 1.0, %v507_v36  ;;  %vm512_vm10 = vweird.f32 %v730_v27  ;;  %v350_v8 = vand.u32 2147483647, %v1002_v41 }
 0x1a8   :  { %570 = vst [vmem:[%s1195_s3 + $0x20] sm:$0xff] %v400_v37  ;;  %v449_v13 = vmul.f32 %v728_v23, %v448_v39  ;;  %vm513_vm14 = vmor %vm511_vm12, %vm512_vm10  ;;  %v352_v11 = vand.u32 2147483648, %v1002_v41  ;;  %v412_v15 = vand.u32 2147483648, %v998_v31  ;;  %vm346_vm2 = vweird.f32 %v1002_v41 }
 0x1a9   :  { %566 = vst [vmem:[%s1195_s3] sm:$0xff] %v340_v42  ;;  %v509_v16 = vmul.f32 %v730_v27, %v508_v45  ;;  %vm1043_vm4 = vcmp.eq.f32.partialorder %v350_v8, 8.507059e+37  ;;  %vm406_vm5 = vweird.f32 %v998_v31 }
 0x1aa   :  { %v450_v50 = vadd.f32 %v728_v23, %v449_v13  ;;  %v353_v19 = vor.u32 1.1754944e-38, %v352_v11 }
 0x1ab   :  { %v510_v51 = vadd.f32 %v730_v27, %v509_v16  ;;  %v732_v54 = vpop.eup %731 }
 0x1ac   :  { %v454_v56 = vsel %vm453_vm13, %v728_v23, %v450_v50  ;;  %v1019_v58 = vpop.xlane.xlu0 %298  ;;  %v734_v59 = vpop.eup %733  ;;  %v402_v2 = vmul.f32 %v732_v54, %v998_v31  ;;  %vm407_vm1 = vweird.f32 %v732_v54  ;;  %v413_v23 = vor.u32 1.1754944e-38, %v412_v15 }
 0x1ad   :  { %v514_v61 = vsel %vm513_vm14, %v730_v27, %v510_v51  ;;  %v459_v0 = vsel %vm456_vm15, %v458_v52, %v454_v56  ;;  %v1022_v4 = vpop.xlane.xlu1 %312  ;;  %v342_v7 = vmul.f32 %v734_v59, %v1002_v41  ;;  %v1027_v9 = vpop.xlane.xlu2 %314  ;;  %vm347_vm3 = vweird.f32 %v734_v59  ;;  %vm408_vm6 = vmor %vm406_vm5, %vm407_vm1 }
 0x1ae   :  { %v519_v5 = vsel %vm516_vm0, %v518_v55, %v514_v61  ;;  %v460_v6 = vmul.f32 %v939_v22, %v459_v0  ;;  %v403_v12 = vsub.f32 1.0, %v402_v2  ;;  %735 = vrcp.f32 %v1027_v9  ;;  %vm348_vm8 = vmor %vm346_vm2, %vm347_vm3 }
 0x1af   :  { %v520_v10 = vmul.f32 %v941_v24, %v519_v5  ;;  %v343_v14 = vsub.f32 1.0, %v342_v7  ;;  %v410_v22 = vand.u32 2147483647, %v998_v31  ;;  %737 = vrcp.f32 %v1022_v4 }
 0x1b0   :  { %574 = vst [vmem:[%s1195_s3 + $0x40] sm:$0xff] %v460_v6  ;;  %v404_v24 = vmul.f32 %v732_v54, %v403_v12  ;;  %739 = vrcp.f32 %v1019_v58  ;;  %v485_v25 = vand.u32 2147483647, %v1027_v9  ;;  %vm481_vm9 = vweird.f32 %v1027_v9 }
 0x1b1   :  { %578 = vst [vmem:[%s1195_s3 + $0x60] sm:$0xff] %v520_v10  ;;  %v344_v17 = vmul.f32 %v734_v59, %v343_v14  ;;  %vm411_vm7 = vcmp.eq.f32.partialorder %v410_v22, 8.507059e+37  ;;  %v487_v29 = vand.u32 2147483648, %v1027_v9  ;;  %v470_v37 = vand.u32 2147483647, %v1022_v4 }
 0x1b2   :  { %v405_v20 = vadd.f32 %v732_v54, %v404_v24  ;;  %vm466_vm10 = vweird.f32 %v1022_v4  ;;  %vm1064_vm11 = vcmp.eq.f32.partialorder %v485_v25, 8.507059e+37  ;;  %v472_v13 = vand.u32 2147483648, %v1022_v4 }
 0x1b3   :  { %v345_v21 = vadd.f32 %v734_v59, %v344_v17  ;;  %v488_v48 = vor.u32 1.1754944e-38, %v487_v29  ;;  %vm1077_vm13 = vcmp.eq.f32.partialorder %v470_v37, 8.507059e+37  ;;  %v365_v50 = vand.u32 2147483647, %v1019_v58 }
 0x1b4   :  { %v1049_v26 = vpop.xlane.xlu0 %316  ;;  %v736_v27 = vpop.eup %735  ;;  %v409_v28 = vsel %vm408_vm6, %v732_v54, %v405_v20  ;;  %v367_v55 = vand.u32 2147483648, %v1019_v58  ;;  %vm361_vm15 = vweird.f32 %v1019_v58 }
 0x1b5   :  { %v1053_v30 = vpop.xlane.xlu1 %306  ;;  %741 = vrcp.f32 %v1049_v26  ;;  %v738_v31 = vpop.eup %737  ;;  %v349_v33 = vsel %vm348_vm8, %v734_v59, %v345_v21  ;;  %v414_v34 = vsel %vm411_vm7, %v413_v23, %v409_v28  ;;  %v477_v36 = vmul.f32 %v736_v27, %v1027_v9 }
 0x1b6   :  { %v354_v38 = vsel %vm1043_vm4, %v353_v19, %v349_v33  ;;  %v415_v39 = vmul.f32 %v948_v32, %v414_v34  ;;  %v462_v41 = vmul.f32 %v738_v31, %v1022_v4  ;;  %v740_v42 = vpop.eup %739  ;;  %743 = vrcp.f32 %v1053_v30 }
 0x1b7   :  { %v355_v45 = vmul.f32 %v951_v35, %v354_v38  ;;  %v478_v46 = vsub.f32 1.0, %v477_v36  ;;  %v357_v16 = vmul.f32 %v740_v42, %v1019_v58  ;;  %vm482_vm12 = vweird.f32 %v736_v27 }
 0x1b8   :  { %571 = vst [vmem:[%s1195_s3 + $0x28] sm:$0xff] %v415_v39  ;;  %v463_v32 = vsub.f32 1.0, %v462_v41  ;;  %vm467_vm14 = vweird.f32 %v738_v31  ;;  %v473_v59 = vor.u32 1.1754944e-38, %v472_v13  ;;  %vm483_vm0 = vmor %vm481_vm9, %vm482_vm12  ;;  %vm362_vm1 = vweird.f32 %v740_v42 }
 0x1b9   :  { %567 = vst [vmem:[%s1195_s3 + $0x8] sm:$0xff] %v355_v45  ;;  %v479_v35 = vmul.f32 %v736_v27, %v478_v46  ;;  %v358_v54 = vsub.f32 1.0, %v357_v16  ;;  %v500_v6 = vand.u32 2147483647, %v1049_v26  ;;  %vm468_vm2 = vmor %vm466_vm10, %vm467_vm14  ;;  %vm1092_vm3 = vcmp.eq.f32.partialorder %v365_v50, 8.507059e+37 }
 0x1ba   :  { %v464_v52 = vmul.f32 %v738_v31, %v463_v32  ;;  %v368_v22 = vor.u32 1.1754944e-38, %v367_v55  ;;  %vm363_vm4 = vmor %vm361_vm15, %vm362_vm1  ;;  %v502_v18 = vand.u32 2147483648, %v1049_v26  ;;  %vm496_vm6 = vweird.f32 %v1049_v26 }
 0x1bb   :  { %v742_v51 = vpop.eup %741  ;;  %v480_v56 = vadd.f32 %v736_v27, %v479_v35  ;;  %v359_v5 = vmul.f32 %v740_v42, %v358_v54  ;;  %v425_v25 = vand.u32 2147483647, %v1053_v30  ;;  %vm501_vm9 = vcmp.eq.f32.partialorder %v500_v6, 8.507059e+37 }
 0x1bc   :  { %v492_v61 = vmul.f32 %v742_v51, %v1049_v26  ;;  %v1085_v0 = vpop.xlane.xlu2 %308  ;;  %v465_v2 = vadd.f32 %v738_v31, %v464_v52  ;;  %v744_v11 = vpop.eup %743  ;;  %vm497_vm5 = vweird.f32 %v742_v51  ;;  %v503_v33 = vor.u32 1.1754944e-38, %v502_v18 }
 0x1bd   :  { %v484_v7 = vsel %vm483_vm0, %v736_v27, %v480_v56  ;;  %745 = vrcp.f32 %v1085_v0  ;;  %v360_v14 = vadd.f32 %v740_v42, %v359_v5  ;;  %v1099_v15 = vpop.xlane.xlu1 %300  ;;  %v417_v17 = vmul.f32 %v744_v11, %v1053_v30  ;;  %v1110_v23 = vpop.xlane.xlu0 %322  ;;  %vm498_vm8 = vmor %vm496_vm6, %vm497_vm5 }
 0x1be   :  { %v493_v10 = vsub.f32 1.0, %v492_v61  ;;  %v489_v9 = vsel %vm1064_vm11, %v488_v48, %v484_v7  ;;  %v469_v12 = vsel %vm468_vm2, %v738_v31, %v465_v2  ;;  %747 = vrcp.f32 %v1099_v15 }
 0x1bf   :  { %v490_v24 = vmul.f32 %v958_v43, %v489_v9  ;;  %v474_v4 = vsel %vm1077_vm13, %v473_v59, %v469_v12  ;;  %v364_v20 = vsel %vm363_vm4, %v740_v42, %v360_v14  ;;  %v418_v58 = vsub.f32 1.0, %v417_v17 }
 0x1c0   :  { %v475_v19 = vmul.f32 %v960_v44, %v474_v4  ;;  %v494_v21 = vmul.f32 %v742_v51, %v493_v10  ;;  %v369_v43 = vsel %vm1092_vm3, %v368_v22, %v364_v20  ;;  %v427_v27 = vand.u32 2147483648, %v1053_v30 }
 0x1c1   :  { %576 = vst [vmem:[%s1195_s3 + $0x50] sm:$0xff] %v490_v24  ;;  %v370_v44 = vmul.f32 %v955_v40, %v369_v43  ;;  %v419_v31 = vmul.f32 %v744_v11, %v418_v58  ;;  %vm422_vm7 = vweird.f32 %v744_v11  ;;  %749 = vrcp.f32 %v1110_v23 }
 0x1c2   :  { %575 = vst [vmem:[%s1195_s3 + $0x48] sm:$0xff] %v475_v19  ;;  %v495_v28 = vadd.f32 %v742_v51, %v494_v21  ;;  %vm421_vm10 = vweird.f32 %v1053_v30  ;;  %v440_v38 = vand.u32 2147483647, %v1085_v0  ;;  %v428_v39 = vor.u32 1.1754944e-38, %v427_v27 }
 0x1c3   :  { %v746_v29 = vpop.eup %745  ;;  %568 = vst [vmem:[%s1195_s3 + $0x10] sm:$0xff] %v370_v44  ;;  %v420_v36 = vadd.f32 %v744_v11, %v419_v31  ;;  %vm423_vm11 = vmor %vm421_vm10, %vm422_vm7  ;;  %vm426_vm12 = vcmp.eq.f32.partialorder %v425_v25, 8.507059e+37  ;;  %v442_v47 = vand.u32 2147483648, %v1085_v0  ;;  %vm436_vm14 = vweird.f32 %v1085_v0 }
 0x1c4   :  { %v499_v26 = vsel %vm498_vm8, %v742_v51, %v495_v28  ;;  %v432_v40 = vmul.f32 %v746_v29, %v1085_v0  ;;  %v1131_v34 = vpop.xlane.xlu2 %320  ;;  %v748_v45 = vpop.eup %747  ;;  %vm437_vm13 = vweird.f32 %v746_v29  ;;  %vm1146_vm15 = vcmp.eq.f32.partialorder %v440_v38, 8.507059e+37 }
 0x1c5   :  { %v504_v37 = vsel %vm501_vm9, %v503_v33, %v499_v26  ;;  %v424_v46 = vsel %vm423_vm11, %v744_v11, %v420_v36  ;;  %751 = vrcp.f32 %v1131_v34  ;;  %v372_v48 = vmul.f32 %v748_v45, %v1099_v15  ;;  %v1142_v32 = vpop.xlane.xlu1 %324  ;;  %vm438_vm0 = vmor %vm436_vm14, %vm437_vm13 }
 0x1c6   :  { %v505_v41 = vmul.f32 %v968_v53, %v504_v37  ;;  %v433_v42 = vsub.f32 1.0, %v432_v40  ;;  %v429_v13 = vsel %vm426_vm12, %v428_v39, %v424_v46  ;;  %v380_v51 = vand.u32 2147483647, %v1099_v15 }
 0x1c7   :  { %v750_v53 = vpop.eup %749  ;;  %v430_v16 = vmul.f32 %v970_v57, %v429_v13  ;;  %v373_v50 = vsub.f32 1.0, %v372_v48  ;;  %v443_v54 = vor.u32 1.1754944e-38, %v442_v47  ;;  %v382_v57 = vand.u32 2147483648, %v1099_v15 }
 0x1c8   :  { %577 = vst [vmem:[%s1195_s3 + $0x58] sm:$0xff] %v505_v41  ;;  %v434_v30 = vmul.f32 %v746_v29, %v433_v42  ;;  %v537_v52 = vmul.f32 %v750_v53, %v1110_v23  ;;  %v545_v55 = vand.u32 2147483647, %v1110_v23  ;;  %753 = vrcp.f32 %v1142_v32 }
 0x1c9   :  { %572 = vst [vmem:[%s1195_s3 + $0x30] sm:$0xff] %v430_v16  ;;  %v374_v59 = vmul.f32 %v748_v45, %v373_v50  ;;  %vm377_vm1 = vweird.f32 %v748_v45  ;;  %vm376_vm2 = vweird.f32 %v1099_v15  ;;  %vm542_vm3 = vweird.f32 %v750_v53 }
 0x1ca   :  { %v435_v49 = vadd.f32 %v746_v29, %v434_v30  ;;  %v538_v61 = vsub.f32 1.0, %v537_v52  ;;  %v547_v5 = vand.u32 2147483648, %v1110_v23  ;;  %vm378_vm4 = vmor %vm376_vm2, %vm377_vm1  ;;  %vm381_vm5 = vcmp.eq.f32.partialorder %v380_v51, 8.507059e+37 }
 0x1cb   :  { %v752_v0 = vpop.eup %751  ;;  %v375_v7 = vadd.f32 %v748_v45, %v374_v59  ;;  %v383_v11 = vor.u32 1.1754944e-38, %v382_v57  ;;  %vm541_vm6 = vweird.f32 %v1110_v23  ;;  %v530_v9 = vand.u32 2147483647, %v1131_v34 }
 0x1cc   :  { %v439_v56 = vsel %vm438_vm0, %v746_v29, %v435_v49  ;;  %v539_v8 = vmul.f32 %v750_v53, %v538_v61  ;;  %v522_v10 = vmul.f32 %v752_v0, %v1131_v34  ;;  %vm546_vm7 = vcmp.eq.f32.partialorder %v545_v55, 8.507059e+37  ;;  %vm543_vm8 = vmor %vm541_vm6, %vm542_vm3 }
 0x1cd   :  { %v444_v2 = vsel %vm1146_vm15, %v443_v54, %v439_v56  ;;  %v379_v12 = vsel %vm378_vm4, %v748_v45, %v375_v7  ;;  %v548_v24 = vor.u32 1.1754944e-38, %v547_v5  ;;  %vm527_vm9 = vweird.f32 %v752_v0 }
 0x1ce   :  { %v445_v6 = vmul.f32 %v978_v62, %v444_v2  ;;  %v540_v14 = vadd.f32 %v750_v53, %v539_v8  ;;  %v523_v22 = vsub.f32 1.0, %v522_v10  ;;  %v754_v62 = vpop.eup %753  ;;  %v384_v15 = vsel %vm381_vm5, %v383_v11, %v379_v12 }
 0x1cf   :  { %v532_v4 = vand.u32 2147483648, %v1131_v34  ;;  %v385_v17 = vmul.f32 %v980_v1, %v384_v15  ;;  %v552_v20 = vmul.f32 %v754_v62, %v1142_v32  ;;  %vm526_vm10 = vweird.f32 %v1131_v34 }
 0x1d0   :  { %573 = vst [vmem:[%s1195_s3 + $0x38] sm:$0xff] %v445_v6  ;;  %v544_v18 = vsel %vm543_vm8, %v750_v53, %v540_v14  ;;  %v524_v19 = vmul.f32 %v752_v0, %v523_v22  ;;  %vm528_vm11 = vmor %vm526_vm10, %vm527_vm9  ;;  %vm531_vm12 = vcmp.eq.f32.partialorder %v530_v9, 8.507059e+37  ;;  %v562_v1 = vand.u32 2147483648, %v1142_v32 }
 0x1d1   :  { %v549_v21 = vsel %vm546_vm7, %v548_v24, %v544_v18  ;;  %569 = vst [vmem:[%s1195_s3 + $0x18] sm:$0xff] %v385_v17  ;;  %v553_v58 = vsub.f32 1.0, %v552_v20  ;;  %v533_v44 = vor.u32 1.1754944e-38, %v532_v4  ;;  %vm557_vm13 = vweird.f32 %v754_v62 }
 0x1d2   :  { %v550_v23 = vmul.f32 %v976_v60, %v549_v21  ;;  %v525_v43 = vadd.f32 %v752_v0, %v524_v19  ;;  %v560_v28 = vand.u32 2147483647, %v1142_v32  ;;  %vm556_vm14 = vweird.f32 %v1142_v32 }
 0x1d3   :  { %v554_v27 = vmul.f32 %v754_v62, %v553_v58  ;;  %vm558_vm15 = vmor %vm556_vm14, %vm557_vm13  ;;  %v563_v33 = vor.u32 1.1754944e-38, %v562_v1 }
 0x1d4   :  { %580 = vst [vmem:[%s1195_s3 + $0x70] sm:$0xff] %v550_v23  ;;  %v529_v25 = vsel %vm528_vm11, %v752_v0, %v525_v43  ;;  %vm561_vm0 = vcmp.eq.f32.partialorder %v560_v28, 8.507059e+37 }
 0x1d5   :  { %v534_v29 = vsel %vm531_vm12, %v533_v44, %v529_v25  ;;  %v555_v31 = vadd.f32 %v754_v62, %v554_v27 }
 0x1d6   :  { %v535_v60 = vmul.f32 %v985_v63, %v534_v29 }
 0x1d7   :  { %v559_v26 = vsel %vm558_vm15, %v754_v62, %v555_v31 }
 0x1d8   :  { %579 = vst [vmem:[%s1195_s3 + $0x68] sm:$0xff] %v535_v60  ;;  %v564_v40 = vsel %vm561_vm0, %v563_v33, %v559_v26 }
 0x1d9   :  { %v565_v34 = vmul.f32 %v987_v3, %v564_v40 }
 0x1db   :  { %581 = vst [vmem:[%s1195_s3 + $0x78] sm:$0xff] %v565_v34 }

</bundles_post_ra>
